<compile_context>
chip_gen: v5e
topology: v5e:2x2
jax: 0.10.0
libtpu: 0.0.40
codegen_flags: <defaults>
</compile_context>

<pallas_src>
import functools

import jax
import jax.numpy as jnp
from jax.experimental import pallas as pl
from jax.experimental.pallas import tpu as pltpu


def _round_up(x, m):
    return (x + m - 1) // m * m


def _cdiv(a, b):
    return (a + b - 1) // b


def _mae_kernel(n_rows, tiles_per_core, has_weight, *refs):
    if has_weight:
        logits_ref, labels_ref, wrow_ref, out_ref = refs
    else:
        logits_ref, labels_ref, out_ref = refs
        wrow_ref = None

    p = pl.program_id(0)          # parallel (per-TensorCore) axis
    i = pl.program_id(1)          # sequential row-tile axis
    tn = logits_ref.shape[0]

    # Cast inside VMEM so bf16 inputs only pay bf16 HBM bytes; math stays f32.
    x = logits_ref[...].astype(jnp.float32)          # (TN, C)
    labels = labels_ref[...]                         # (TN, 1) int32

    # Numerically stable softmax pieces — the normalized (TN, C) score is never
    # materialized; only the picked exponent and the row denominator are used.
    m = jnp.max(x, axis=1, keepdims=True)            # (TN, 1)  XLU
    e = jnp.exp(x - m)                               # (TN, C)  EUP
    denom = jnp.sum(e, axis=1, keepdims=True)        # (TN, 1)  XLU

    # picked[r] = e[r, labels[r]] via a single select + lane reduce.
    col = jax.lax.broadcasted_iota(jnp.int32, x.shape, dimension=1)
    picked = jnp.sum(jnp.where(col == labels, e, 0.0),
                     axis=1, keepdims=True)          # (TN, 1)

    # Approx reciprocal (EUP vrcp, otherwise-idle slot) + one Newton step for
    # full f32 accuracy; denom >= 1 so this is well conditioned.
    r = pl.reciprocal(denom, approx=True)
    r = r * (2.0 - denom * r)
    mae = 1.0 - picked * r                            # (TN, 1)

    if has_weight:
        # Per-row weight w[labels[r]] was gathered in the wrapper.
        mae = mae * wrow_ref[...]

    # Mask rows that are padding past the true batch size.
    row0 = (p * tiles_per_core + i) * tn
    row = jax.lax.broadcasted_iota(jnp.int32, mae.shape, dimension=0) + row0
    mae = jnp.where(row < n_rows, mae, 0.0)

    # Per-core resident (1,1,1) accumulator; init on this core's first tile.
    @pl.when(i == 0)
    def _():
        out_ref[...] = jnp.zeros_like(out_ref)

    out_ref[...] += jnp.sum(mae)


@functools.partial(
    jax.jit,
    static_argnames=("num_classes", "scale", "reduction", "block_rows",
                     "num_cores"))
def mean_absolute_error(logits, labels, cls_weight=None, *, num_classes,
                        scale=1.0, reduction="mean", block_rows=None,
                        num_cores=2):
    n, c = logits.shape
    assert c == num_classes
    if reduction not in ("mean", "sum"):
        raise ValueError(f"unknown reduction: {reduction}")

    has_weight = cls_weight is not None

    # ---- Byte-budgeted row tile --------------------------------------------
    # Target ~2 MiB of native-dtype logits per tile so the DMA time (>= a few
    # us) dwarfs the ~0.35 us per-grid-step overhead, regardless of C.
    itemsize = jnp.dtype(logits.dtype).itemsize
    target_bytes = 2 * 1024 * 1024
    rows = max(16, target_bytes // (c * itemsize))
    if block_rows is not None:                 # test/override hook
        rows = min(rows, block_rows)
    rows = min(rows, max(n, 16))               # never tile past the batch
    tn = _round_up(rows, 16)

    n_tiles = _cdiv(n, tn)
    tiles_per_core = _cdiv(n_tiles, num_cores)
    n_pad = num_cores * tiles_per_core * tn

    logits_p = jnp.pad(logits, ((0, n_pad - n), (0, 0)))
    labels_p = jnp.pad(labels.astype(jnp.int32), (0, n_pad - n)).reshape(n_pad, 1)

    row_idx = lambda p, i: (p * tiles_per_core + i, 0)
    in_specs = [
        pl.BlockSpec((tn, c), row_idx),
        pl.BlockSpec((tn, 1), row_idx),
    ]
    args = [logits_p, labels_p]
    if has_weight:
        # Hoist the per-class gather out of the kernel: (N,) gather is trivial
        # in XLA and removes a full (TN, C) mul + lane reduce from the kernel.
        w_rows = cls_weight.astype(jnp.float32)[labels]
        w_rows = jnp.pad(w_rows, (0, n_pad - n)).reshape(n_pad, 1)
        in_specs.append(pl.BlockSpec((tn, 1), row_idx))
        args.append(w_rows)

    # VMEM budget: double-buffered native-dtype logits + (generous) f32
    # temporaries inside the body + small label/weight columns + slack.
    vmem_bytes = (2 * tn * c * itemsize          # double-buffered logits DMA
                  + 3 * tn * c * 4               # f32 temporaries (x, e, select)
                  + 4 * tn * 4 * 2               # labels + weight columns
                  + (2 << 20))                   # slack
    vmem_bytes = int(max(min(vmem_bytes, 48 << 20), 8 << 20))

    partials = pl.pallas_call(
        functools.partial(_mae_kernel, n, tiles_per_core, has_weight),
        out_shape=jax.ShapeDtypeStruct((num_cores, 1, 1), jnp.float32),
        grid_spec=pltpu.PrefetchScalarGridSpec(
            num_scalar_prefetch=0,
            grid=(num_cores, tiles_per_core),
            in_specs=in_specs,
            # Each parallel core writes its OWN block -> no cross-core race.
            out_specs=pl.BlockSpec((1, 1, 1), lambda p, i: (p, 0, 0)),
        ),
        compiler_params=pltpu.CompilerParams(
            dimension_semantics=("parallel", "arbitrary"),
            vmem_limit_bytes=vmem_bytes),
    )(*args)

    total = jnp.sum(partials)
    if reduction == "mean":
        total = total / jnp.float32(n)
    return jnp.float32(scale) * total


def _reference(logits, labels, cls_weight=None, *, scale=1.0, reduction="mean"):
    score = jax.nn.softmax(logits.astype(jnp.float32), axis=1)
    one_hot = jax.nn.one_hot(labels, logits.shape[1], dtype=jnp.float32)
    mae = 1.0 - jnp.sum(one_hot * score, axis=1)
    if cls_weight is not None:
        mae = mae * cls_weight.astype(jnp.float32)[labels]
    red = jnp.mean(mae) if reduction == "mean" else jnp.sum(mae)
    return scale * red


if __name__ == "__main__":
    key = jax.random.PRNGKey(0)
    k1, k2, k3, k4, k5 = jax.random.split(key, 5)

    # Case 1: default module config (weight=None -> uniform), small batch.
    N1, C1 = 8, 32
    logits1 = jax.random.normal(k1, (N1, C1), dtype=jnp.float32)
    labels1 = jax.random.randint(k2, (N1,), 0, C1, dtype=jnp.int32)
    out1 = mean_absolute_error(logits1, labels1,
                               num_classes=C1, scale=1.0, reduction="mean")
    out1 = jax.block_until_ready(out1)
    ref1 = _reference(logits1, labels1, scale=1.0, reduction="mean")
    assert jnp.allclose(out1, ref1, atol=1e-5, rtol=1e-5), (out1, ref1)

    # Case 2: explicit class weights, 'sum' reduction, bf16 logits, and a
    # forced small tile (block_rows=32) so the grid has several row tiles per
    # core plus masked padded tail rows.
    N2, C2 = 100, 32
    logits2 = jax.random.normal(k3, (N2, C2), dtype=jnp.float32).astype(jnp.bfloat16)
    labels2 = jax.random.randint(k4, (N2,), 0, C2, dtype=jnp.int32)
    weight2 = jax.random.uniform(k5, (C2,), dtype=jnp.float32, minval=0.5, maxval=1.5)
    out2 = mean_absolute_error(logits2, labels2, weight2,
                               num_classes=C2, scale=2.0, reduction="sum",
                               block_rows=32)
    out2 = jax.block_until_ready(out2)
    ref2 = _reference(logits2, labels2, weight2, scale=2.0, reduction="sum")
    assert jnp.allclose(out2, ref2, atol=1e-4, rtol=1e-4), (out2, ref2)

    print("KERNEL_OK")
</pallas_src>

<mosaic_0001>
module attributes {stable_mosaic.version = 11 : i64} {
  func.func @_mae_kernel(%arg0: i32, %arg1: i32, %arg2: memref<16x32xf32, #tpu.memory_space<vmem>>, %arg3: memref<16x1xi32, #tpu.memory_space<vmem>>, %arg4: memref<1x1x1xf32, #tpu.memory_space<vmem>>) attributes {dimension_semantics = [#tpu.dimension_semantics<parallel>, #tpu.dimension_semantics<arbitrary>], iteration_bounds = array<i64: 2, 1>, scalar_prefetch = 0 : i64, scratch_operands = 0 : i64, tpu.core_type = #tpu.core_type<tc>, window_params = [{transform_indices = @transform_0, window_bounds = array<i64: 16, 32>}, {transform_indices = @transform_1, window_bounds = array<i64: 16, 1>}, {transform_indices = @transform_2, window_bounds = array<i64: 1, 1, 1>}]} {
    %c0 = arith.constant 0 : index
    %c0_0 = arith.constant 0 : index
    %0 = vector.load %arg2[%c0, %c0_0] : memref<16x32xf32, #tpu.memory_space<vmem>>, vector<16x32xf32>
    %c0_1 = arith.constant 0 : index
    %c0_2 = arith.constant 0 : index
    %1 = vector.load %arg3[%c0_1, %c0_2] : memref<16x1xi32, #tpu.memory_space<vmem>>, vector<16x1xi32>
    %cst = arith.constant dense<0xFF800000> : vector<16xf32>
    %2 = vector.multi_reduction <maximumf>, %0, %cst [1] : vector<16x32xf32> to vector<16xf32>
    %3 = vector.shape_cast %2 : vector<16xf32> to vector<16x1xf32>
    %4 = vector.broadcast %3 : vector<16x1xf32> to vector<16x32xf32>
    %5 = arith.subf %0, %4 : vector<16x32xf32>
    %6 = math.exp %5 : vector<16x32xf32>
    %cst_3 = arith.constant dense<0.000000e+00> : vector<16xf32>
    %7 = vector.multi_reduction <add>, %6, %cst_3 [1] : vector<16x32xf32> to vector<16xf32>
    %8 = vector.shape_cast %7 : vector<16xf32> to vector<16x1xf32>
    %9 = tpu.iota {dimensions = array<i32: 1>} : vector<16x32xi32>
    %10 = vector.broadcast %1 : vector<16x1xi32> to vector<16x32xi32>
    %11 = arith.cmpi eq, %9, %10 : vector<16x32xi32>
    %cst_4 = arith.constant 0.000000e+00 : f32
    %12 = vector.broadcast %cst_4 : f32 to vector<16x32xf32>
    %13 = arith.select %11, %6, %12 : vector<16x32xi1>, vector<16x32xf32>
    %cst_5 = arith.constant dense<0.000000e+00> : vector<16xf32>
    %14 = vector.multi_reduction <add>, %13, %cst_5 [1] : vector<16x32xf32> to vector<16xf32>
    %15 = vector.shape_cast %14 : vector<16xf32> to vector<16x1xf32>
    %16 = tpu.reciprocal %8 {approx = true} : vector<16x1xf32> -> vector<16x1xf32>
    %17 = arith.mulf %8, %16 : vector<16x1xf32>
    %cst_6 = arith.constant 2.000000e+00 : f32
    %18 = vector.broadcast %cst_6 : f32 to vector<16x1xf32>
    %19 = arith.subf %18, %17 : vector<16x1xf32>
    %20 = arith.mulf %16, %19 : vector<16x1xf32>
    %21 = arith.mulf %15, %20 : vector<16x1xf32>
    %cst_7 = arith.constant 1.000000e+00 : f32
    %22 = vector.broadcast %cst_7 : f32 to vector<16x1xf32>
    %23 = arith.subf %22, %21 : vector<16x1xf32>
    %c1_i32 = arith.constant 1 : i32
    %24 = arith.muli %arg0, %c1_i32 : i32
    %25 = arith.addi %24, %arg1 : i32
    %c16_i32 = arith.constant 16 : i32
    %26 = arith.muli %25, %c16_i32 : i32
    %27 = tpu.iota {dimensions = array<i32: 0>} : vector<16x1xi32>
    %28 = vector.broadcast %26 : i32 to vector<16x1xi32>
    %29 = arith.addi %27, %28 : vector<16x1xi32>
    %c8_i32 = arith.constant 8 : i32
    %30 = vector.broadcast %c8_i32 : i32 to vector<16x1xi32>
    %31 = arith.cmpi slt, %29, %30 : vector<16x1xi32>
    %cst_8 = arith.constant 0.000000e+00 : f32
    %32 = vector.broadcast %cst_8 : f32 to vector<16x1xf32>
    %33 = arith.select %31, %23, %32 : vector<16x1xi1>, vector<16x1xf32>
    %c0_i32 = arith.constant 0 : i32
    %34 = arith.cmpi eq, %arg1, %c0_i32 : i32
    %35 = arith.extui %34 : i1 to i32
    %c0_i32_9 = arith.constant 0 : i32
    %36 = arith.cmpi ne, %35, %c0_i32_9 : i32
    scf.if %36 {
      %cst_17 = arith.constant 0.000000e+00 : f32
      %45 = vector.broadcast %cst_17 : f32 to vector<1x1x1xf32>
      %c0_18 = arith.constant 0 : index
      %c0_19 = arith.constant 0 : index
      %c0_20 = arith.constant 0 : index
      %46 = vector.load %arg4[%c0_18, %c0_19, %c0_20] : memref<1x1x1xf32, #tpu.memory_space<vmem>>, vector<1x1x1xf32>
      tpu.vector_store %arg4[%c0_18, %c0_19, %c0_20], %45 {strides = array<i32>} : memref<1x1x1xf32, #tpu.memory_space<vmem>>, vector<1x1x1xf32>,
    } else {
    }
    %c0_10 = arith.constant 0 : index
    %c0_11 = arith.constant 0 : index
    %c0_12 = arith.constant 0 : index
    %37 = vector.load %arg4[%c0_10, %c0_11, %c0_12] : memref<1x1x1xf32, #tpu.memory_space<vmem>>, vector<1x1x1xf32>
    %38 = vector.shape_cast %33 : vector<16x1xf32> to vector<1x16x1xf32>
    %cst_13 = arith.constant dense<0.000000e+00> : vector<1xf32>
    %39 = vector.multi_reduction <add>, %38, %cst_13 [1, 2] : vector<1x16x1xf32> to vector<1xf32>
    %40 = vector.shape_cast %39 : vector<1xf32> to vector<1x1x1xf32>
    %41 = vector.extract %40[0, 0, 0] : f32 from vector<1x1x1xf32>
    %42 = vector.broadcast %41 : f32 to vector<1x1x1xf32>
    %43 = arith.addf %37, %42 : vector<1x1x1xf32>
    %c0_14 = arith.constant 0 : index
    %c0_15 = arith.constant 0 : index
    %c0_16 = arith.constant 0 : index
    %44 = vector.load %arg4[%c0_14, %c0_15, %c0_16] : memref<1x1x1xf32, #tpu.memory_space<vmem>>, vector<1x1x1xf32>
    tpu.vector_store %arg4[%c0_14, %c0_15, %c0_16], %43 {strides = array<i32>} : memref<1x1x1xf32, #tpu.memory_space<vmem>>, vector<1x1x1xf32>,
    return
  }
  func.func @transform_0(%arg0: i32, %arg1: i32) -> (i32, i32) {
    %c1_i32 = arith.constant 1 : i32
    %0 = arith.muli %arg0, %c1_i32 : i32
    %1 = arith.addi %0, %arg1 : i32
    %c0_i32 = arith.constant 0 : i32
    %c0_i32_0 = arith.constant 0 : i32
    return %1, %c0_i32 : i32, i32
  }
  func.func @transform_1(%arg0: i32, %arg1: i32) -> (i32, i32) {
    %c1_i32 = arith.constant 1 : i32
    %0 = arith.muli %arg0, %c1_i32 : i32
    %1 = arith.addi %0, %arg1 : i32
    %c0_i32 = arith.constant 0 : i32
    %c0_i32_0 = arith.constant 0 : i32
    return %1, %c0_i32 : i32, i32
  }
  func.func @transform_2(%arg0: i32, %arg1: i32) -> (i32, i32, i32) {
    %c0_i32 = arith.constant 0 : i32
    %c0_i32_0 = arith.constant 0 : i32
    %c0_i32_1 = arith.constant 0 : i32
    return %arg0, %c0_i32, %c0_i32_0 : i32, i32, i32
  }
}

</mosaic_0001>

<bundles_post_ra>
// kernel: mean_absolute_error.1
= control target key start
LH: loop header
LB: loop body
LE: loop exit
PB: predicated region body
PF: predicated region fallthrough
CT: control target
= control target key end

     0   :  { %s437_s9 = smov 0   ;;  %s439_s10 = smov 0   ;;  %s485_s0 = inlined_call_operand.vmem [shape: f32[32,32], index: 0, kind: input, shape index: {}]   ;;  %s486_s1 = inlined_call_operand.vmem [shape: s32[32,1], index: 1, kind: input, shape index: {}]   ;;  %s487_s2 = inlined_call_operand.vmem [shape: f32[2,1,1], index: 2, kind: output, shape index: {}]  }
   0x1   :  { %s441_s11 = smov 0  }
   0x2 LB: > { %s24_s12 = sadd.s32 1, %s414_s10  ;;  %p350_p0 = scmp.ge.s32.totalorder %s418_s11, 1  ;;  %s418_s11 = sphi %s441_s11, %s12_s11   ;;  %s414_s10 = sphi %s439_s10, %s489_s10   ;;  %s410_s9 = sphi %s437_s9, %s488_s9  }
   0x3   : > { %p26_p1 = scmp.ge.s32.totalorder %s24_s12, 2  ;;  %p144_p2 = scmp.lt.s32.totalorder %s418_s11, 3 }
   0x5   : > { %s491_s12 = smov (%p26_p1, %s24_s12), 0  ;;  %p145_p3 = pnand %p350_p0, %p144_p2 }
   0x6   : > { %s351_s13 = sshll.u32 (!%p145_p3), %s410_s9, 1  ;;  %s355_s21 = sshll.u32 (!%p145_p3), %s410_s9, 4 }
   0x7   : > { %148 = sbr.rel (%p145_p3) target bundleno = 472 (0x1d8), region = 28  ;;  %p173_p4 = scmp.lt.s32.totalorder (!%p145_p3), %s351_s13, 3 }
   0x8   : > { %p187_p5 = scmp.lt.s32.totalorder (!%p145_p3), %s410_s9, 1 }
   0xc   : > { %v420_v0 = vmov 0   ;;  %s493_s13 = smov (!%p173_p4, %s351_s13), 3  ;;  %vm194_vm0 = vcmask 261120   ;;  %v213_v9 = vlaneseq  ;;  %v248_v32 = vstv %s355_s21  ;;  %s495_s9 = smov (!%p187_p5, %s410_s9), 1 }
   0xd   : > { %386 = vset.pattern.permute.xlu1 %v420_v0  ;;  %387 = vset.pattern.permute.xlu0 %v420_v0  ;;  %s352_s14 = sshll.u32 %s493_s13, 3  ;;  %vm262_vm5 = vcmask 7168   ;;  %s189_s24 = scalar_lea.vmem %s487_s2, %s495_s9  ;;  %vm259_vm6 = vcmask 0   ;;  %v421_v51 = vmov 0.0  }
   0xe   : > { %s176_s17 = scalar_lea.vmem %s485_s0, %s352_s14  ;;  %s184_s20 = scalar_lea.vmem %s486_s1, %s352_s14  ;;  %v214_v12 = vand.u32 127, %v213_v9  ;;  %v246_v31 = vshrl.u32 %v213_v9, 7  ;;  %260 = vst.msk [vmem:[%s189_s24] sm:$0x1] %vm259_vm6, %v421_v51 }
   0xf   : > { %v190_v1 = vld [vmem:[%s176_s17] sm:$0xff]  ;;  %v191_v4 = vld [vmem:[%s176_s17 + $0x8] sm:$0xff] }
  0x10   : > { %v192_v2 = vld [vmem:[%s184_s20] sm:$0xff]  ;;  %v195_v3 = vsel %vm194_vm0, %v190_v1, -inf  ;;  %v193_v5 = vld [vmem:[%s184_s20 + $0x8] sm:$0xff]  ;;  %v198_v6 = vsel %vm194_vm0, %v191_v4, -inf  ;;  %v247_v35 = vadd.s32 8, %v246_v31  ;;  %v249_v38 = vadd.s32 %v248_v32, %v246_v31 }
  0x11   : > { %216 = vperm.xlu1 %386, %v192_v2   ;;  %196 = vmax.xlane.f32.xlu0 %v195_v3 }
  0x12   : > { %v250_v40 = vadd.s32 %v248_v32, %v247_v35  ;;  %vm251_vm3 = vcmp.lt.s32.totalorder %v249_v38, 8 }
  0x14   : > { %vm252_vm4 = vcmp.lt.s32.totalorder %v250_v40, 8 }
  0x15   : > { %v261_v59 = vld [vmem:[%s189_s24] sm:$0x1] }
  0x19   : > { %219 = vperm.xlu1 %386, %v193_v5   ;;  %199 = vmax.xlane.f32.xlu0 %v198_v6 }
  0x83   : > { %v217_v11 = vpop.permute.xlu1 %216 }
  0x84   : > { %v197_v7 = vpop.xlane.xlu0 %196  ;;  %vm221_vm1 = vcmp.eq.s32.totalorder %v214_v12, %v217_v11 }
  0x85   : > { %v201_v8 = vsub.f32 %v190_v1, %v197_v7 }
  0x87   : > { %v203_v10 = vmul.f32 1.442695, %v201_v8 }
  0x89   : > { %388 = vpow2.f32 %v203_v10 }
  0x8b   : > { %v220_v20 = vpop.permute.xlu1 %219 }
  0x8c   : > { %v200_v13 = vpop.xlane.xlu0 %199  ;;  %vm222_vm2 = vcmp.eq.s32.totalorder %v214_v12, %v220_v20 }
  0x8d   : > { %v202_v14 = vsub.f32 %v191_v4, %v200_v13 }
  0x8f   : > { %v389_v15 = vpop.eup %388  ;;  %v205_v16 = vmul.f32 1.442695, %v202_v14 }
  0x90   : > { %v207_v17 = vsel %vm194_vm0, %v389_v15, 0.0  ;;  %v223_v18 = vsel %vm221_vm1, %v389_v15, 0.0 }
  0x91   : > { %390 = vpow2.f32 %v205_v16  ;;  %208 = vadd.xlane.f32.xlu2 %v207_v17  ;;  %v225_v19 = vsel %vm194_vm0, %v223_v18, 0.0 }
  0x92   : > { %226 = vadd.xlane.f32.xlu0 %v225_v19 }
  0x97   : > { %v391_v21 = vpop.eup %390 }
  0x98   : > { %v210_v22 = vsel %vm194_vm0, %v391_v21, 0.0  ;;  %v224_v23 = vsel %vm222_vm2, %v391_v21, 0.0 }
  0x99   : > { %211 = vadd.xlane.f32.xlu2 %v210_v22  ;;  %v228_v24 = vsel %vm194_vm0, %v224_v23, 0.0 }
  0x9a   : > { %229 = vadd.xlane.f32.xlu1 %v228_v24 }
 0x104   : > { %v209_v25 = vpop.xlane.xlu2 %208 }
 0x105   : > { %392 = vrcp.f32 %v209_v25  ;;  %v227_v34 = vpop.xlane.xlu0 %226 }
 0x10b   : > { %v393_v26 = vpop.eup %392 }
 0x10c   : > { %v233_v27 = vmul.f32 %v393_v26, %v209_v25  ;;  %v212_v28 = vpop.xlane.xlu2 %211 }
 0x10d   : > { %394 = vrcp.f32 %v212_v28  ;;  %v230_v43 = vpop.xlane.xlu1 %229 }
 0x10e   : > { %v235_v29 = vsub.f32 2.0, %v233_v27 }
 0x110   : > { %v237_v30 = vmul.f32 %v393_v26, %v235_v29 }
 0x112   : > { %v239_v36 = vmul.f32 %v237_v30, %v227_v34 }
 0x113   : > { %v395_v33 = vpop.eup %394 }
 0x114   : > { %v234_v37 = vmul.f32 %v395_v33, %v212_v28  ;;  %v241_v41 = vsub.f32 1.0, %v239_v36 }
 0x116   : > { %v236_v39 = vsub.f32 2.0, %v234_v37  ;;  %v253_v45 = vsel %vm251_vm3, %v241_v41, 0.0 }
 0x117   : > { %v263_v48 = vsel %vm262_vm5, %v253_v45, 0.0 }
 0x118   : > { %v238_v42 = vmul.f32 %v395_v33, %v236_v39 }
 0x11a   : > { %v240_v44 = vmul.f32 %v238_v42, %v230_v43 }
 0x11c   : > { %v242_v46 = vsub.f32 1.0, %v240_v44 }
 0x11e   : > { %v254_v47 = vsel %vm252_vm4, %v242_v46, 0.0 }
 0x11f   : > { %v264_v49 = vsel %vm262_vm5, %v254_v47, 0.0 }
 0x120   : > { %v265_v50 = vadd.f32 %v264_v49, %v263_v48 }
 0x122   : > { %266 = vadd.xlane.f32.xlu2 %v265_v50 }
 0x195   : > { %v267_v52 = vpop.xlane.xlu2 %266 }
 0x196   : > { %v268_v53 = vrot.slane %v267_v52, 4 }
 0x198   : > { %v269_v54 = vadd.f32 %v268_v53, %v267_v52 }
 0x19a   : > { %v270_v55 = vrot.slane %v269_v54, 2 }
 0x19c   : > { %v271_v56 = vadd.f32 %v270_v55, %v269_v54 }
 0x19e   : > { %v272_v57 = vrot.slane %v271_v56, 1 }
 0x1a0   : > { %v273_v58 = vadd.f32 %v272_v57, %v271_v56 }
 0x1a2   : > { %358 = vpush %v273_v58 }
 0x1d3   : > { %s359_s25 = spop %358 }
 0x1d4   : > { %v275_v60 = vstv %s359_s25 }
 0x1d5   : > { %v276_v61 = vadd.f32 %v275_v60, %v261_v59 }
 0x1d7   : > { %278 = vst.msk [vmem:[%s189_s24] sm:$0x1] %vm259_vm6, %v276_v61 }
 0x1d8 PF: > { %s12_s11 = sadd.s32 1, %s418_s11   ;;  %s488_s9 = smov %s414_s10 }
 0x1d9   : > { %p9_p6 = scmp.ge.s32.totalorder %s12_s11, 4   ;;  %s489_s10 = smov %s491_s12 }
 0x1db   :  { %11 = sbr.rel (!%p9_p6) target bundleno = 2 (0x2), region = 65 }

</bundles_post_ra>
